<compile_context>
chip_gen: v6e
topology: v6e:2x2x1
jax: 0.10.0
libtpu: 0.0.40
codegen_flags: <defaults>
</compile_context>

<pallas_src>
import functools

import numpy as np
import jax
import jax.numpy as jnp
from jax.experimental import pallas as pl
from jax.experimental.pallas import tpu as pltpu


def _round_up(x, m):
    return (x + m - 1) // m * m


def _mtile(M):
    """Row-tile size and padded M for the matmul grid."""
    tm = 256 if M >= 256 else _round_up(max(M, 8), 8)
    return tm, _round_up(M, tm)


# --------------------------------------------------------------------------
# Pallas kernels: fused matmul + bias (+ residual) (+ ReLU), f32 accumulator
# --------------------------------------------------------------------------

def _epilogue(out, relu_cols, n_cols):
    """ReLU the first `relu_cols` output columns (0 = none, >= n_cols = all)."""
    if relu_cols <= 0:
        return out
    if relu_cols >= n_cols:
        return jnp.maximum(out, 0.0)
    mask = jax.lax.broadcasted_iota(jnp.int32, out.shape, 1) < relu_cols
    return jnp.where(mask, jnp.maximum(out, 0.0), out)


def _mm_kernel(x_ref, w_ref, b_ref, o_ref, acc_ref, *, relu_cols, n_cols):
    k = pl.program_id(1)

    @pl.when(k == 0)
    def _init():
        acc_ref[...] = jnp.zeros_like(acc_ref)

    acc_ref[...] += jnp.dot(x_ref[...], w_ref[...],
                            preferred_element_type=jnp.float32)

    @pl.when(k == pl.num_programs(1) - 1)
    def _finalize():
        out = acc_ref[...] + b_ref[...]
        o_ref[...] = _epilogue(out, relu_cols, n_cols)


def _mm_res_kernel(x_ref, w_ref, b_ref, r_ref, o_ref, acc_ref, *,
                   relu_cols, n_cols):
    k = pl.program_id(1)

    @pl.when(k == 0)
    def _init():
        acc_ref[...] = jnp.zeros_like(acc_ref)

    acc_ref[...] += jnp.dot(x_ref[...], w_ref[...],
                            preferred_element_type=jnp.float32)

    @pl.when(k == pl.num_programs(1) - 1)
    def _finalize():
        out = acc_ref[...] + b_ref[...] + r_ref[...]
        o_ref[...] = _epilogue(out, relu_cols, n_cols)


def matmul_fused(x, w_pad, b_pad, residual=None, relu_cols=0):
    """out = epilogue( x @ w + b [+ residual] )

    x:         (M, K)    activation patches (cast to bf16 for the MXU)
    w_pad:     (Kp, Nc)  bf16, BN-folded and padded once at parameter-build time
    b_pad:     (1, Nc)   f32
    residual:  optional (Mp, Nc) f32, added in the f32 epilogue
    relu_cols: ReLU is applied to the first `relu_cols` output columns.
    returns    (Mp, Nc) f32 padded output; caller slices the valid region.
    """
    M, K = x.shape
    Kp, Nc = w_pad.shape
    tm, Mp = _mtile(M)
    tk = next(t for t in (512, 256, 128) if Kp % t == 0)

    xp = jnp.pad(x, ((0, Mp - M), (0, Kp - K))).astype(jnp.bfloat16)

    in_specs = [
        pl.BlockSpec((tm, tk), lambda i, k: (i, k)),
        pl.BlockSpec((tk, Nc), lambda i, k: (k, 0)),
        pl.BlockSpec((1, Nc), lambda i, k: (0, 0)),
    ]
    args = [xp, w_pad, b_pad]
    bytes_accessed = xp.size * 2 + w_pad.size * 2 + b_pad.size * 4 + Mp * Nc * 4
    if residual is not None:
        assert residual.shape == (Mp, Nc), (residual.shape, (Mp, Nc))
        in_specs.append(pl.BlockSpec((tm, Nc), lambda i, k: (i, 0)))
        args.append(residual.astype(jnp.float32))
        bytes_accessed += Mp * Nc * 4
        kernel = functools.partial(_mm_res_kernel, relu_cols=relu_cols, n_cols=Nc)
    else:
        kernel = functools.partial(_mm_kernel, relu_cols=relu_cols, n_cols=Nc)

    return pl.pallas_call(
        kernel,
        out_shape=jax.ShapeDtypeStruct((Mp, Nc), jnp.float32),
        grid=(Mp // tm, Kp // tk),
        in_specs=in_specs,
        out_specs=pl.BlockSpec((tm, Nc), lambda i, k: (i, 0)),
        scratch_shapes=[pltpu.VMEM((tm, Nc), jnp.float32)],
        compiler_params=pltpu.CompilerParams(
            dimension_semantics=("parallel", "arbitrary")),
        cost_estimate=pl.CostEstimate(
            flops=2 * Mp * Kp * Nc,
            transcendentals=0,
            bytes_accessed=int(bytes_accessed)),
    )(*args)


# --------------------------------------------------------------------------
# Layer glue (NHWC, transpose-free im2col)
# --------------------------------------------------------------------------

def _im2col_3x3(x, stride):
    """NHWC 3x3 im2col with padding=1.  Row order is (kh, kw, C) — matches
    pack_conv.  Cast to bf16 before stacking to halve the patch HBM traffic."""
    B, H, W, C = x.shape
    Ho = (H + 2 - 3) // stride + 1
    Wo = (W + 2 - 3) // stride + 1
    xb = x.astype(jnp.bfloat16)
    xp = jnp.pad(xb, ((0, 0), (1, 1), (1, 1), (0, 0)))
    cols = []
    for di in range(3):
        for dj in range(3):
            cols.append(xp[:, di:di + (Ho - 1) * stride + 1:stride,
                              dj:dj + (Wo - 1) * stride + 1:stride, :])
    patches = jnp.stack(cols, axis=3)          # (B, Ho, Wo, 9, C) — no transpose
    return patches.reshape(B * Ho * Wo, 9 * C), (Ho, Wo)


def residual_block_forward(p, x, x_padded=None):
    """One residual_block (eval mode, BN folded) on an NHWC activation.

    x_padded: optional (Mp, Np) padded matmul output of the previous block,
    reusable as the identity shortcut (stride==1, Cin==cout) without re-padding.
    Returns (nhwc_output, padded_matmul_output).
    """
    B, H, W, Cin = x.shape
    s = p["stride"]
    cout = p["conv2"]["N"]
    Np = p["conv2"]["w"].shape[1]

    patches1, (Ho, Wo) = _im2col_3x3(x, s)
    M = B * Ho * Wo
    _, Mp = _mtile(M)

    if p["conv1_1"]:
        # conv1(3x3,s)+bn1+ReLU and conv3(1x1,s) projection in ONE matmul:
        # columns [0, Np) = relu(conv1+bn1); columns [Np, 2*Np) = conv3.
        both = matmul_fused(patches1, p["conv13"]["w"], p["conv13"]["b"],
                            relu_cols=Np)
        y_nhwc = both[:M, :cout].reshape(B, Ho, Wo, cout)
        shortcut = both[:, Np:]                     # (Mp, Np), already padded
    else:
        y = matmul_fused(patches1, p["conv1"]["w"], p["conv1"]["b"],
                         relu_cols=Np)
        y_nhwc = y[:M, :cout].reshape(B, Ho, Wo, cout)
        if x_padded is not None:
            shortcut = x_padded                     # reuse padded prev output
        else:
            shortcut = jnp.pad(x.reshape(M, Cin), ((0, Mp - M), (0, Np - Cin)))

    # conv2 (3x3, stride 1, pad 1) + bn2 + residual add + ReLU -> one fused matmul
    patches2, _ = _im2col_3x3(y_nhwc, 1)
    out = matmul_fused(patches2, p["conv2"]["w"], p["conv2"]["b"],
                       residual=shortcut, relu_cols=Np)
    return out[:M, :cout].reshape(B, Ho, Wo, cout), out


def res_block_forward(blocks_packed, x_nchw):
    x = jnp.transpose(x_nchw, (0, 2, 3, 1))        # NCHW -> NHWC, once
    padded = None
    for p in blocks_packed:
        can_reuse = (not p["conv1_1"]) and p["stride"] == 1 \
            and padded is not None and x.shape[-1] == p["conv2"]["N"]
        x, padded = residual_block_forward(
            p, x, x_padded=padded if can_reuse else None)
    return jnp.transpose(x, (0, 3, 1, 2))          # back to NCHW, once


# --------------------------------------------------------------------------
# Parameters: deterministic synthetic init, BN folded + packed at build time
# --------------------------------------------------------------------------

class KeyGen:
    def __init__(self, seed):
        self.key = jax.random.PRNGKey(seed)

    def __call__(self):
        self.key, sub = jax.random.split(self.key)
        return sub


def fold_bn(w, b, gamma, beta, mean, var, eps=1e-5):
    scale = gamma / jnp.sqrt(var + eps)
    return w * scale[:, None, None, None], (b - mean) * scale + beta


def pack_conv(w, b):
    """(O, C, kh, kw) conv -> padded (Kp, Np) bf16 matmul weight (row order
    (kh, kw, C), matching _im2col_3x3) + padded (1, Np) f32 bias."""
    O, C, kh, kw = w.shape
    K = kh * kw * C
    w2 = jnp.transpose(w, (2, 3, 1, 0)).reshape(K, O)
    Kp = _round_up(K, 128)
    Np = _round_up(O, 128)
    return {
        "w": jnp.pad(w2, ((0, Kp - K), (0, Np - O))).astype(jnp.bfloat16),
        "b": jnp.pad(b.reshape(1, O), ((0, 0), (0, Np - O))).astype(jnp.float32),
        "K": K, "N": O,
    }


def pack_conv13(w1, b1, w3, b3):
    """Fused weight for conv1 (3x3, BN-folded) and conv3 (1x1 projection).

    The 1x1/stride-s input equals the centre tap of the 3x3 im2col, so w3 is
    embedded at rows [4*Cin, 5*Cin).  Result: (Kp, 2*Np) bf16 + (1, 2*Np) bias;
    output columns [0, Np) are conv1, [Np, 2*Np) are conv3.
    """
    O, Cin, _, _ = w1.shape
    K = 9 * Cin
    Kp = _round_up(K, 128)
    Np = _round_up(O, 128)
    w1m = jnp.transpose(w1, (2, 3, 1, 0)).reshape(K, O)
    w3m = jnp.zeros((K, O), w3.dtype).at[4 * Cin:5 * Cin, :].set(
        jnp.transpose(w3.reshape(O, Cin), (1, 0)))
    wcat = jnp.concatenate([
        jnp.pad(w1m, ((0, Kp - K), (0, Np - O))),
        jnp.pad(w3m, ((0, Kp - K), (0, Np - O)))], axis=1).astype(jnp.bfloat16)
    bcat = jnp.concatenate([
        jnp.pad(b1.reshape(1, O), ((0, 0), (0, Np - O))),
        jnp.pad(b3.reshape(1, O), ((0, 0), (0, Np - O)))],
        axis=1).astype(jnp.float32)
    return {"w": wcat, "b": bcat, "K": K, "N": O}


def _conv_init(kg, cin, cout, k):
    fan_in = cin * k * k
    w = jax.random.normal(kg(), (cout, cin, k, k), jnp.float32) * np.sqrt(2.0 / fan_in)
    b = 0.01 * jax.random.normal(kg(), (cout,), jnp.float32)
    return w, b


def _bn_init(kg, c):
    gamma = 1.0 + 0.1 * jax.random.normal(kg(), (c,), jnp.float32)
    beta = 0.1 * jax.random.normal(kg(), (c,), jnp.float32)
    mean = 0.1 * jax.random.normal(kg(), (c,), jnp.float32)
    var = 1.0 + 0.2 * jax.random.uniform(kg(), (c,), jnp.float32)
    return gamma, beta, mean, var


def make_residual_block_params(kg, cin, cout, conv1_1, stride):
    w1, b1 = _conv_init(kg, cin, cout, 3)
    bn1 = _bn_init(kg, cout)
    w2, b2 = _conv_init(kg, cout, cout, 3)
    bn2 = _bn_init(kg, cout)

    w1f, b1f = fold_bn(w1, b1, *bn1)
    packed = {
        "stride": stride,
        "conv1_1": conv1_1,
        "conv2": pack_conv(*fold_bn(w2, b2, *bn2)),
    }
    raw = {"stride": stride, "conv1_1": conv1_1,
           "w1": w1, "b1": b1, "bn1": bn1,
           "w2": w2, "b2": b2, "bn2": bn2}
    if conv1_1:
        w3, b3 = _conv_init(kg, cin, cout, 1)   # projection shortcut (no BN)
        packed["conv13"] = pack_conv13(w1f, b1f, w3, b3)
        raw["w3"], raw["b3"] = w3, b3
    else:
        packed["conv1"] = pack_conv(w1f, b1f)
    return packed, raw


def make_res_block_params(kg, in_channels, out_channels, num_blocks, is_b2=False):
    packed, raw = [], []
    for i in range(num_blocks):
        if i == 0 and is_b2 is not True:
            p, r = make_residual_block_params(kg, in_channels, out_channels,
                                              conv1_1=True, stride=2)
        else:
            p, r = make_residual_block_params(kg, out_channels, out_channels,
                                              conv1_1=False, stride=1)
        packed.append(p)
        raw.append(r)
    return packed, raw


# --------------------------------------------------------------------------
# Pure-JAX f32 reference (matches the PyTorch eval-mode forward)
# --------------------------------------------------------------------------

def _conv_ref(x, w, b, stride, padding):
    out = jax.lax.conv_general_dilated(
        x, w, window_strides=(stride, stride),
        padding=((padding, padding), (padding, padding)),
        dimension_numbers=("NCHW", "OIHW", "NCHW"))
    return out + b[None, :, None, None]


def _bn_ref(x, bn, eps=1e-5):
    gamma, beta, mean, var = bn
    inv = gamma / jnp.sqrt(var + eps)
    return (x - mean[None, :, None, None]) * inv[None, :, None, None] \
        + beta[None, :, None, None]


def res_block_ref(raw_blocks, x):
    for r in raw_blocks:
        s = r["stride"]
        y = jax.nn.relu(_bn_ref(_conv_ref(x, r["w1"], r["b1"], s, 1), r["bn1"]))
        y = _bn_ref(_conv_ref(y, r["w2"], r["b2"], 1, 1), r["bn2"])
        if r["conv1_1"]:
            x = _conv_ref(x, r["w3"], r["b3"], s, 0)
        x = jax.nn.relu(y + x)
    return x


# --------------------------------------------------------------------------
# Main
# --------------------------------------------------------------------------

if __name__ == "__main__":
    in_channels, out_channels, num_blocks = 4, 8, 2
    B, H, W = 2, 16, 16

    kg = KeyGen(42)
    blocks_packed, blocks_raw = make_res_block_params(
        kg, in_channels, out_channels, num_blocks, is_b2=False)

    x = jax.random.normal(jax.random.PRNGKey(0), (B, in_channels, H, W),
                          jnp.float32)

    fwd = jax.jit(lambda xx: res_block_forward(blocks_packed, xx))
    out = jax.block_until_ready(fwd(x))

    assert out.shape == (B, out_channels, H // 2, W // 2), out.shape
    out_np = np.asarray(out)
    assert np.all(np.isfinite(out_np))

    # Sanity check vs f32 reference (bf16 MXU operands -> loose tolerance).
    ref_np = np.asarray(res_block_ref(blocks_raw, x))
    max_err = float(np.max(np.abs(out_np - ref_np)))
    tol = 0.05 * float(np.max(np.abs(ref_np))) + 0.05
    assert max_err <= tol, (max_err, tol)

    print("KERNEL_OK")
</pallas_src>

<mosaic_0001>
module attributes {stable_mosaic.version = 11 : i64} {
  func.func @_mm_kernel(%arg0: i32, %arg1: i32, %arg2: memref<128x128xbf16, #tpu.memory_space<vmem>>, %arg3: memref<128x256xbf16, #tpu.memory_space<vmem>>, %arg4: memref<1x256xf32, #tpu.memory_space<vmem>>, %arg5: memref<128x256xf32, #tpu.memory_space<vmem>>, %arg6: memref<128x256xf32, #tpu.memory_space<vmem>>) attributes {dimension_semantics = [#tpu.dimension_semantics<parallel>, #tpu.dimension_semantics<arbitrary>], iteration_bounds = array<i64: 1, 1>, scalar_prefetch = 0 : i64, scratch_operands = 1 : i64, tpu.core_type = #tpu.core_type<tc>, window_params = [{transform_indices = @transform_0, window_bounds = array<i64: 128, 128>}, {transform_indices = @transform_1, window_bounds = array<i64: 128, 256>}, {pipeline_mode = #tpu.pipeline_mode<synchronous>, transform_indices = @transform_2, window_bounds = array<i64: 1, 256>}, {transform_indices = @transform_3, window_bounds = array<i64: 128, 256>}]} {
    %c0_i32 = arith.constant 0 : i32
    %0 = arith.cmpi eq, %arg1, %c0_i32 : i32
    %1 = arith.extui %0 : i1 to i32
    %c0_i32_0 = arith.constant 0 : i32
    %2 = arith.cmpi ne, %1, %c0_i32_0 : i32
    scf.if %2 {
      %cst_10 = arith.constant 0.000000e+00 : f32
      %12 = vector.broadcast %cst_10 : f32 to vector<128x256xf32>
      %c0_11 = arith.constant 0 : index
      %c0_12 = arith.constant 0 : index
      %13 = vector.load %arg6[%c0_11, %c0_12] : memref<128x256xf32, #tpu.memory_space<vmem>>, vector<128x256xf32>
      tpu.vector_store %arg6[%c0_11, %c0_12], %12 {strides = array<i32>} : memref<128x256xf32, #tpu.memory_space<vmem>>, vector<128x256xf32>,
    } else {
    }
    %c0 = arith.constant 0 : index
    %c0_1 = arith.constant 0 : index
    %3 = vector.load %arg6[%c0, %c0_1] : memref<128x256xf32, #tpu.memory_space<vmem>>, vector<128x256xf32>
    %c0_2 = arith.constant 0 : index
    %c0_3 = arith.constant 0 : index
    %4 = vector.load %arg2[%c0_2, %c0_3] : memref<128x128xbf16, #tpu.memory_space<vmem>>, vector<128x128xbf16>
    %c0_4 = arith.constant 0 : index
    %c0_5 = arith.constant 0 : index
    %5 = vector.load %arg3[%c0_4, %c0_5] : memref<128x256xbf16, #tpu.memory_space<vmem>>, vector<128x256xbf16>
    %cst = arith.constant dense<0.000000e+00> : vector<128x256xf32>
    %6 = tpu.matmul %4, %5, %cst {dimension_numbers = #tpu.dot_dimension_numbers<[1], [0], [0], [1], [0, 0, 1, 1], [], []>} : vector<128x128xbf16>, vector<128x256xbf16>, vector<128x256xf32> -> vector<128x256xf32>
    %7 = arith.addf %3, %6 : vector<128x256xf32>
    %c0_6 = arith.constant 0 : index
    %c0_7 = arith.constant 0 : index
    %8 = vector.load %arg6[%c0_6, %c0_7] : memref<128x256xf32, #tpu.memory_space<vmem>>, vector<128x256xf32>
    tpu.vector_store %arg6[%c0_6, %c0_7], %7 {strides = array<i32>} : memref<128x256xf32, #tpu.memory_space<vmem>>, vector<128x256xf32>,
    %c0_i32_8 = arith.constant 0 : i32
    %9 = arith.cmpi eq, %arg1, %c0_i32_8 : i32
    %10 = arith.extui %9 : i1 to i32
    %c0_i32_9 = arith.constant 0 : i32
    %11 = arith.cmpi ne, %10, %c0_i32_9 : i32
    scf.if %11 {
      %c0_10 = arith.constant 0 : index
      %c0_11 = arith.constant 0 : index
      %12 = vector.load %arg6[%c0_10, %c0_11] : memref<128x256xf32, #tpu.memory_space<vmem>>, vector<128x256xf32>
      %c0_12 = arith.constant 0 : index
      %c0_13 = arith.constant 0 : index
      %13 = vector.load %arg4[%c0_12, %c0_13] : memref<1x256xf32, #tpu.memory_space<vmem>>, vector<1x256xf32>
      %14 = vector.broadcast %13 : vector<1x256xf32> to vector<128x256xf32>
      %15 = arith.addf %12, %14 : vector<128x256xf32>
      %16 = tpu.iota {dimensions = array<i32: 1>} : vector<128x256xi32>
      %c128_i32 = arith.constant 128 : i32
      %17 = vector.broadcast %c128_i32 : i32 to vector<128x256xi32>
      %18 = arith.cmpi slt, %16, %17 : vector<128x256xi32>
      %cst_14 = arith.constant 0.000000e+00 : f32
      %19 = vector.broadcast %cst_14 : f32 to vector<128x256xf32>
      %20 = arith.maximumf %15, %19 : vector<128x256xf32>
      %21 = arith.select %18, %20, %15 : vector<128x256xi1>, vector<128x256xf32>
      %c0_15 = arith.constant 0 : index
      %c0_16 = arith.constant 0 : index
      %22 = vector.load %arg5[%c0_15, %c0_16] : memref<128x256xf32, #tpu.memory_space<vmem>>, vector<128x256xf32>
      tpu.vector_store %arg5[%c0_15, %c0_16], %21 {strides = array<i32>} : memref<128x256xf32, #tpu.memory_space<vmem>>, vector<128x256xf32>,
    } else {
    }
    return
  }
  func.func @transform_0(%arg0: i32, %arg1: i32) -> (i32, i32) {
    %c0_i32 = arith.constant 0 : i32
    return %arg0, %arg1 : i32, i32
  }
  func.func @transform_1(%arg0: i32, %arg1: i32) -> (i32, i32) {
    %c0_i32 = arith.constant 0 : i32
    %c0_i32_0 = arith.constant 0 : i32
    return %arg1, %c0_i32 : i32, i32
  }
  func.func @transform_2(%arg0: i32, %arg1: i32) -> (i32, i32) {
    %c0_i32 = arith.constant 0 : i32
    %c0_i32_0 = arith.constant 0 : i32
    %c0_i32_1 = arith.constant 0 : i32
    return %c0_i32, %c0_i32_0 : i32, i32
  }
  func.func @transform_3(%arg0: i32, %arg1: i32) -> (i32, i32) {
    %c0_i32 = arith.constant 0 : i32
    %c0_i32_0 = arith.constant 0 : i32
    return %arg0, %c0_i32 : i32, i32
  }
}

module attributes {stable_mosaic.version = 11 : i64} {
  func.func @_mm_res_kernel(%arg0: i32, %arg1: i32, %arg2: memref<128x128xbf16, #tpu.memory_space<vmem>>, %arg3: memref<128x128xbf16, #tpu.memory_space<vmem>>, %arg4: memref<1x128xf32, #tpu.memory_space<vmem>>, %arg5: memref<128x128xf32, #tpu.memory_space<vmem>>, %arg6: memref<128x128xf32, #tpu.memory_space<vmem>>, %arg7: memref<128x128xf32, #tpu.memory_space<vmem>>) attributes {dimension_semantics = [#tpu.dimension_semantics<parallel>, #tpu.dimension_semantics<arbitrary>], iteration_bounds = array<i64: 1, 1>, scalar_prefetch = 0 : i64, scratch_operands = 1 : i64, tpu.core_type = #tpu.core_type<tc>, window_params = [{transform_indices = @transform_0, window_bounds = array<i64: 128, 128>}, {transform_indices = @transform_1, window_bounds = array<i64: 128, 128>}, {pipeline_mode = #tpu.pipeline_mode<synchronous>, transform_indices = @transform_2, window_bounds = array<i64: 1, 128>}, {transform_indices = @transform_3, window_bounds = array<i64: 128, 128>}, {transform_indices = @transform_4, window_bounds = array<i64: 128, 128>}]} {
    %c0_i32 = arith.constant 0 : i32
    %0 = arith.cmpi eq, %arg1, %c0_i32 : i32
    %1 = arith.extui %0 : i1 to i32
    %c0_i32_0 = arith.constant 0 : i32
    %2 = arith.cmpi ne, %1, %c0_i32_0 : i32
    scf.if %2 {
      %cst_10 = arith.constant 0.000000e+00 : f32
      %12 = vector.broadcast %cst_10 : f32 to vector<128x128xf32>
      %c0_11 = arith.constant 0 : index
      %c0_12 = arith.constant 0 : index
      %13 = vector.load %arg7[%c0_11, %c0_12] : memref<128x128xf32, #tpu.memory_space<vmem>>, vector<128x128xf32>
      tpu.vector_store %arg7[%c0_11, %c0_12], %12 {strides = array<i32>} : memref<128x128xf32, #tpu.memory_space<vmem>>, vector<128x128xf32>,
    } else {
    }
    %c0 = arith.constant 0 : index
    %c0_1 = arith.constant 0 : index
    %3 = vector.load %arg7[%c0, %c0_1] : memref<128x128xf32, #tpu.memory_space<vmem>>, vector<128x128xf32>
    %c0_2 = arith.constant 0 : index
    %c0_3 = arith.constant 0 : index
    %4 = vector.load %arg2[%c0_2, %c0_3] : memref<128x128xbf16, #tpu.memory_space<vmem>>, vector<128x128xbf16>
    %c0_4 = arith.constant 0 : index
    %c0_5 = arith.constant 0 : index
    %5 = vector.load %arg3[%c0_4, %c0_5] : memref<128x128xbf16, #tpu.memory_space<vmem>>, vector<128x128xbf16>
    %cst = arith.constant dense<0.000000e+00> : vector<128x128xf32>
    %6 = tpu.matmul %4, %5, %cst {dimension_numbers = #tpu.dot_dimension_numbers<[1], [0], [0], [1], [0, 0, 1, 1], [], []>} : vector<128x128xbf16>, vector<128x128xbf16>, vector<128x128xf32> -> vector<128x128xf32>
    %7 = arith.addf %3, %6 : vector<128x128xf32>
    %c0_6 = arith.constant 0 : index
    %c0_7 = arith.constant 0 : index
    %8 = vector.load %arg7[%c0_6, %c0_7] : memref<128x128xf32, #tpu.memory_space<vmem>>, vector<128x128xf32>
    tpu.vector_store %arg7[%c0_6, %c0_7], %7 {strides = array<i32>} : memref<128x128xf32, #tpu.memory_space<vmem>>, vector<128x128xf32>,
    %c0_i32_8 = arith.constant 0 : i32
    %9 = arith.cmpi eq, %arg1, %c0_i32_8 : i32
    %10 = arith.extui %9 : i1 to i32
    %c0_i32_9 = arith.constant 0 : i32
    %11 = arith.cmpi ne, %10, %c0_i32_9 : i32
    scf.if %11 {
      %c0_10 = arith.constant 0 : index
      %c0_11 = arith.constant 0 : index
      %12 = vector.load %arg7[%c0_10, %c0_11] : memref<128x128xf32, #tpu.memory_space<vmem>>, vector<128x128xf32>
      %c0_12 = arith.constant 0 : index
      %c0_13 = arith.constant 0 : index
      %13 = vector.load %arg4[%c0_12, %c0_13] : memref<1x128xf32, #tpu.memory_space<vmem>>, vector<1x128xf32>
      %14 = vector.broadcast %13 : vector<1x128xf32> to vector<128x128xf32>
      %15 = arith.addf %12, %14 : vector<128x128xf32>
      %c0_14 = arith.constant 0 : index
      %c0_15 = arith.constant 0 : index
      %16 = vector.load %arg5[%c0_14, %c0_15] : memref<128x128xf32, #tpu.memory_space<vmem>>, vector<128x128xf32>
      %17 = arith.addf %15, %16 : vector<128x128xf32>
      %cst_16 = arith.constant 0.000000e+00 : f32
      %18 = vector.broadcast %cst_16 : f32 to vector<128x128xf32>
      %19 = arith.maximumf %17, %18 : vector<128x128xf32>
      %c0_17 = arith.constant 0 : index
      %c0_18 = arith.constant 0 : index
      %20 = vector.load %arg6[%c0_17, %c0_18] : memref<128x128xf32, #tpu.memory_space<vmem>>, vector<128x128xf32>
      tpu.vector_store %arg6[%c0_17, %c0_18], %19 {strides = array<i32>} : memref<128x128xf32, #tpu.memory_space<vmem>>, vector<128x128xf32>,
    } else {
    }
    return
  }
  func.func @transform_0(%arg0: i32, %arg1: i32) -> (i32, i32) {
    %c0_i32 = arith.constant 0 : i32
    return %arg0, %arg1 : i32, i32
  }
  func.func @transform_1(%arg0: i32, %arg1: i32) -> (i32, i32) {
    %c0_i32 = arith.constant 0 : i32
    %c0_i32_0 = arith.constant 0 : i32
    return %arg1, %c0_i32 : i32, i32
  }
  func.func @transform_2(%arg0: i32, %arg1: i32) -> (i32, i32) {
    %c0_i32 = arith.constant 0 : i32
    %c0_i32_0 = arith.constant 0 : i32
    %c0_i32_1 = arith.constant 0 : i32
    return %c0_i32, %c0_i32_0 : i32, i32
  }
  func.func @transform_3(%arg0: i32, %arg1: i32) -> (i32, i32) {
    %c0_i32 = arith.constant 0 : i32
    %c0_i32_0 = arith.constant 0 : i32
    return %arg0, %c0_i32 : i32, i32
  }
  func.func @transform_4(%arg0: i32, %arg1: i32) -> (i32, i32) {
    %c0_i32 = arith.constant 0 : i32
    %c0_i32_0 = arith.constant 0 : i32
    return %arg0, %c0_i32 : i32, i32
  }
}

module attributes {stable_mosaic.version = 11 : i64} {
  func.func @_mm_kernel(%arg0: i32, %arg1: i32, %arg2: memref<128x128xbf16, #tpu.memory_space<vmem>>, %arg3: memref<128x128xbf16, #tpu.memory_space<vmem>>, %arg4: memref<1x128xf32, #tpu.memory_space<vmem>>, %arg5: memref<128x128xf32, #tpu.memory_space<vmem>>, %arg6: memref<128x128xf32, #tpu.memory_space<vmem>>) attributes {dimension_semantics = [#tpu.dimension_semantics<parallel>, #tpu.dimension_semantics<arbitrary>], iteration_bounds = array<i64: 1, 1>, scalar_prefetch = 0 : i64, scratch_operands = 1 : i64, tpu.core_type = #tpu.core_type<tc>, window_params = [{transform_indices = @transform_0, window_bounds = array<i64: 128, 128>}, {transform_indices = @transform_1, window_bounds = array<i64: 128, 128>}, {pipeline_mode = #tpu.pipeline_mode<synchronous>, transform_indices = @transform_2, window_bounds = array<i64: 1, 128>}, {transform_indices = @transform_3, window_bounds = array<i64: 128, 128>}]} {
    %c0_i32 = arith.constant 0 : i32
    %0 = arith.cmpi eq, %arg1, %c0_i32 : i32
    %1 = arith.extui %0 : i1 to i32
    %c0_i32_0 = arith.constant 0 : i32
    %2 = arith.cmpi ne, %1, %c0_i32_0 : i32
    scf.if %2 {
      %cst_10 = arith.constant 0.000000e+00 : f32
      %12 = vector.broadcast %cst_10 : f32 to vector<128x128xf32>
      %c0_11 = arith.constant 0 : index
      %c0_12 = arith.constant 0 : index
      %13 = vector.load %arg6[%c0_11, %c0_12] : memref<128x128xf32, #tpu.memory_space<vmem>>, vector<128x128xf32>
      tpu.vector_store %arg6[%c0_11, %c0_12], %12 {strides = array<i32>} : memref<128x128xf32, #tpu.memory_space<vmem>>, vector<128x128xf32>,
    } else {
    }
    %c0 = arith.constant 0 : index
    %c0_1 = arith.constant 0 : index
    %3 = vector.load %arg6[%c0, %c0_1] : memref<128x128xf32, #tpu.memory_space<vmem>>, vector<128x128xf32>
    %c0_2 = arith.constant 0 : index
    %c0_3 = arith.constant 0 : index
    %4 = vector.load %arg2[%c0_2, %c0_3] : memref<128x128xbf16, #tpu.memory_space<vmem>>, vector<128x128xbf16>
    %c0_4 = arith.constant 0 : index
    %c0_5 = arith.constant 0 : index
    %5 = vector.load %arg3[%c0_4, %c0_5] : memref<128x128xbf16, #tpu.memory_space<vmem>>, vector<128x128xbf16>
    %cst = arith.constant dense<0.000000e+00> : vector<128x128xf32>
    %6 = tpu.matmul %4, %5, %cst {dimension_numbers = #tpu.dot_dimension_numbers<[1], [0], [0], [1], [0, 0, 1, 1], [], []>} : vector<128x128xbf16>, vector<128x128xbf16>, vector<128x128xf32> -> vector<128x128xf32>
    %7 = arith.addf %3, %6 : vector<128x128xf32>
    %c0_6 = arith.constant 0 : index
    %c0_7 = arith.constant 0 : index
    %8 = vector.load %arg6[%c0_6, %c0_7] : memref<128x128xf32, #tpu.memory_space<vmem>>, vector<128x128xf32>
    tpu.vector_store %arg6[%c0_6, %c0_7], %7 {strides = array<i32>} : memref<128x128xf32, #tpu.memory_space<vmem>>, vector<128x128xf32>,
    %c0_i32_8 = arith.constant 0 : i32
    %9 = arith.cmpi eq, %arg1, %c0_i32_8 : i32
    %10 = arith.extui %9 : i1 to i32
    %c0_i32_9 = arith.constant 0 : i32
    %11 = arith.cmpi ne, %10, %c0_i32_9 : i32
    scf.if %11 {
      %c0_10 = arith.constant 0 : index
      %c0_11 = arith.constant 0 : index
      %12 = vector.load %arg6[%c0_10, %c0_11] : memref<128x128xf32, #tpu.memory_space<vmem>>, vector<128x128xf32>
      %c0_12 = arith.constant 0 : index
      %c0_13 = arith.constant 0 : index
      %13 = vector.load %arg4[%c0_12, %c0_13] : memref<1x128xf32, #tpu.memory_space<vmem>>, vector<1x128xf32>
      %14 = vector.broadcast %13 : vector<1x128xf32> to vector<128x128xf32>
      %15 = arith.addf %12, %14 : vector<128x128xf32>
      %cst_14 = arith.constant 0.000000e+00 : f32
      %16 = vector.broadcast %cst_14 : f32 to vector<128x128xf32>
      %17 = arith.maximumf %15, %16 : vector<128x128xf32>
      %c0_15 = arith.constant 0 : index
      %c0_16 = arith.constant 0 : index
      %18 = vector.load %arg5[%c0_15, %c0_16] : memref<128x128xf32, #tpu.memory_space<vmem>>, vector<128x128xf32>
      tpu.vector_store %arg5[%c0_15, %c0_16], %17 {strides = array<i32>} : memref<128x128xf32, #tpu.memory_space<vmem>>, vector<128x128xf32>,
    } else {
    }
    return
  }
  func.func @transform_0(%arg0: i32, %arg1: i32) -> (i32, i32) {
    %c0_i32 = arith.constant 0 : i32
    return %arg0, %arg1 : i32, i32
  }
  func.func @transform_1(%arg0: i32, %arg1: i32) -> (i32, i32) {
    %c0_i32 = arith.constant 0 : i32
    %c0_i32_0 = arith.constant 0 : i32
    return %arg1, %c0_i32 : i32, i32
  }
  func.func @transform_2(%arg0: i32, %arg1: i32) -> (i32, i32) {
    %c0_i32 = arith.constant 0 : i32
    %c0_i32_0 = arith.constant 0 : i32
    %c0_i32_1 = arith.constant 0 : i32
    return %c0_i32, %c0_i32_0 : i32, i32
  }
  func.func @transform_3(%arg0: i32, %arg1: i32) -> (i32, i32) {
    %c0_i32 = arith.constant 0 : i32
    %c0_i32_0 = arith.constant 0 : i32
    return %arg0, %c0_i32 : i32, i32
  }
}

</mosaic_0001>

<bundles_post_ra>
// kernel: _lambda_.4
= control target key start
LH: loop header
LB: loop body
LE: loop exit
PB: predicated region body
PF: predicated region fallthrough
CT: control target
= control target key end

     0   :  { %v677_v1 = vmov 0   ;;  %v457_v25 = vlaneseq  ;;  %s913_s1 = inlined_call_operand.vmem [shape: bf16[128,256], index: 1, kind: input, shape index: {}]   ;;  %s914_s0 = inlined_call_operand.vmem [shape: bf16[128,128], index: 0, kind: input, shape index: {}]   ;;  %s915_s2 = inlined_call_operand.vmem [shape: f32[1,256], index: 2, kind: input, shape index: {}]   ;;  %s916_s3 = inlined_call_operand.vmem [shape: f32[128,256], index: 3, kind: output, shape index: {}]  }
   0x1   :  { %v645_v0 = vld [vmem:[%s913_s1 + $0x74] ss:$8 sps:$4 sm:$0xff]   ;;  %275 = vmatprep.mubr.bf16.mxu0 %v677_v1  ;;  %315 = vmatprep.mubr.bf16.mxu1 %v677_v1  ;;  %v647_v2 = vld [vmem:[%s913_s1 + $0x70] ss:$8 sps:$4 sm:$0xff]   ;;  %v648_v3 = vld [vmem:[%s913_s1 + $0x64] ss:$8 sps:$4 sm:$0xff]  }
   0x2   :  { %243 = vmatprep.subr.bf16.mxu0 %v645_v0  ;;  %628 = vmatprep.subr.bf16.mxu1 %v645_v0  ;;  %v650_v4 = vld [vmem:[%s913_s1 + $0x60] ss:$8 sps:$4 sm:$0xff]   ;;  %v651_v5 = vld [vmem:[%s913_s1 + $0x54] ss:$8 sps:$4 sm:$0xff]   ;;  %v653_v6 = vld [vmem:[%s913_s1 + $0x50] ss:$8 sps:$4 sm:$0xff]  }
   0x3   :  { %244 = vmatpush1.bf16.msra.mxu0 %v647_v2  ;;  %636 = vmatpush1.bf16.msra.mxu1 %v647_v2  ;;  %v654_v7 = vld [vmem:[%s913_s1 + $0x44] ss:$8 sps:$4 sm:$0xff]   ;;  %v656_v8 = vld [vmem:[%s913_s1 + $0x40] ss:$8 sps:$4 sm:$0xff]   ;;  %v657_v9 = vld [vmem:[%s913_s1 + $0x34] ss:$8 sps:$4 sm:$0xff]  }
   0x4   :  { %245 = vmatprep.subr.bf16.mxu0 %v648_v3  ;;  %629 = vmatprep.subr.bf16.mxu1 %v648_v3  ;;  %v659_v10 = vld [vmem:[%s913_s1 + $0x30] ss:$8 sps:$4 sm:$0xff]   ;;  %v660_v11 = vld [vmem:[%s913_s1 + $0x24] ss:$8 sps:$4 sm:$0xff]   ;;  %v662_v12 = vld [vmem:[%s913_s1 + $0x20] ss:$8 sps:$4 sm:$0xff]  }
   0x5   :  { %v663_v13 = vld [vmem:[%s913_s1 + $0x14] ss:$8 sps:$4 sm:$0xff]   ;;  %v665_v14 = vld [vmem:[%s913_s1 + $0x10] ss:$8 sps:$4 sm:$0xff]   ;;  %v666_v15 = vld [vmem:[%s913_s1 + $0x4] ss:$8 sps:$4 sm:$0xff]  }
   0x6   :  { %v668_v16 = vld [vmem:[%s913_s1] ss:$8 sps:$4 sm:$0xff]   ;;  %v673_v21 = vld [vmem:[%s914_s0 + $0x10] sm:$0xff]   ;;  %v675_v23 = vld [vmem:[%s914_s0 + $0x18] sm:$0xff]   ;;  %v458_v26 = vshrl.u32 %v457_v25, 7 }
   0x7   :  { %246 = vmatpush1.bf16.msra.mxu0 %v650_v4  ;;  %637 = vmatpush1.bf16.msra.mxu1 %v650_v4  ;;  %v669_v17 = vld [vmem:[%s914_s0] sm:$0xff]   ;;  %v671_v19 = vld [vmem:[%s914_s0 + $0x8] sm:$0xff]   ;;  %v674_v22 = vld [vmem:[%s914_s0 + $0x30] sm:$0xff]  }
   0x8   :  { %247 = vmatprep.subr.bf16.mxu0 %v651_v5  ;;  %630 = vmatprep.subr.bf16.mxu1 %v651_v5  ;;  %v670_v18 = vld [vmem:[%s914_s0 + $0x20] sm:$0xff]   ;;  %v672_v20 = vld [vmem:[%s914_s0 + $0x28] sm:$0xff]   ;;  %v676_v24 = vld [vmem:[%s914_s0 + $0x38] sm:$0xff]   ;;  %v459_v27 = vsub.s32 0, %v458_v26  ;;  %v463_v29 = vsub.s32 1, %v458_v26 }
   0x9   :  { %v455_v28 = vld [vmem:[%s915_s2] sm:$0x3] }
   0xa   :  { %v781_v30 = vrot.slane %v455_v28, %v459_v27  ;;  %v783_v31 = vrot.slane %v455_v28, %v463_v29 }
   0xb   :  { %248 = vmatpush1.bf16.msra.mxu0 %v653_v6  ;;  %638 = vmatpush1.bf16.msra.mxu1 %v653_v6 }
   0xc   :  { %249 = vmatprep.subr.bf16.mxu0 %v654_v7  ;;  %631 = vmatprep.subr.bf16.mxu1 %v654_v7 }
   0xf   :  { %250 = vmatpush1.bf16.msra.mxu0 %v656_v8  ;;  %639 = vmatpush1.bf16.msra.mxu1 %v656_v8 }
  0x10   :  { %251 = vmatprep.subr.bf16.mxu0 %v657_v9  ;;  %632 = vmatprep.subr.bf16.mxu1 %v657_v9 }
  0x13   :  { %252 = vmatpush1.bf16.msra.mxu0 %v659_v10  ;;  %640 = vmatpush1.bf16.msra.mxu1 %v659_v10 }
  0x14   :  { %253 = vmatprep.subr.bf16.mxu0 %v660_v11  ;;  %633 = vmatprep.subr.bf16.mxu1 %v660_v11 }
  0x17   :  { %254 = vmatpush1.bf16.msra.mxu0 %v662_v12  ;;  %641 = vmatpush1.bf16.msra.mxu1 %v662_v12 }
  0x18   :  { %255 = vmatprep.subr.bf16.mxu0 %v663_v13  ;;  %634 = vmatprep.subr.bf16.mxu1 %v663_v13 }
  0x1b   :  { %256 = vmatpush1.bf16.msra.mxu0 %v665_v14  ;;  %642 = vmatpush1.bf16.msra.mxu1 %v665_v14 }
  0x1c   :  { %257 = vmatprep.subr.bf16.mxu0 %v666_v15  ;;  %635 = vmatprep.subr.bf16.mxu1 %v666_v15 }
  0x1f   :  { %258 = vmatpush1.bf16.msra.mxu0 %v668_v16  ;;  %643 = vmatpush1.bf16.msra.mxu1 %v668_v16 }
  0x22   :  { %276 = vmatmul.mubr.bf16.vlgmr.msra.gmra.mxu0 %v669_v17  ;;  %316 = vmatmul.mubr.bf16.vlgmr.msra.gmra.mxu1 %v670_v18 }
  0x23   :  { %285 = vmatprep.mubr.bf16.mxu0 %v677_v1  ;;  %325 = vmatprep.mubr.bf16.mxu1 %v677_v1 }
  0x2a   :  { %286 = vmatmul.mubr.bf16.gmra.mxu0 %v671_v19  ;;  %326 = vmatmul.mubr.bf16.gmra.mxu1 %v672_v20 }
  0x2b   :  { %295 = vmatprep.mubr.bf16.mxu0 %v677_v1  ;;  %335 = vmatprep.mubr.bf16.mxu1 %v677_v1 }
  0x32   :  { %296 = vmatmul.mubr.bf16.gmra.mxu0 %v673_v21  ;;  %336 = vmatmul.mubr.bf16.gmra.mxu1 %v674_v22 }
  0x33   :  { %305 = vmatprep.mubr.bf16.mxu0 %v677_v1  ;;  %345 = vmatprep.mubr.bf16.mxu1 %v677_v1 }
  0x3a   :  { %306 = vmatmul.mubr.bf16.gmra.mxu0 %v675_v23  ;;  %346 = vmatmul.mubr.bf16.gmra.mxu1 %v676_v24 }
  0xe2   :  { %v277_v32 = vpop.f32.mrf.mxu0  ;;  %v317_v33 = vpop.f32.mrf.mxu1 }
  0xe3   :  { %v467_v34 = vadd.f32 %v781_v30, %v277_v32  ;;  %v483_v35 = vadd.f32 %v781_v30, %v317_v33 }
  0xe4   :  { %v279_v36 = vpop.f32.mrf.mxu0  ;;  %v319_v37 = vpop.f32.mrf.mxu1 }
  0xe5   :  { %v504_v38 = vmax.f32 %v467_v34, 0.0  ;;  %v520_v39 = vmax.f32 %v483_v35, 0.0  ;;  %v468_v40 = vadd.f32 %v783_v31, %v279_v36  ;;  %v484_v41 = vadd.f32 %v783_v31, %v319_v37 }
  0xe6   :  { %v281_v42 = vpop.f32.mrf.mxu0  ;;  %v321_v43 = vpop.f32.mrf.mxu1 }
  0xe7   :  { %568 = vst [vmem:[%s916_s3] sm:$0xff] %v504_v38  ;;  %584 = vst [vmem:[%s916_s3 + $0x80] sm:$0xff] %v520_v39  ;;  %v469_v44 = vadd.f32 %v781_v30, %v281_v42  ;;  %v485_v45 = vadd.f32 %v781_v30, %v321_v43 }
  0xe8   :  { %569 = vst [vmem:[%s916_s3 + $0x8] sm:$0xff] %v468_v40  ;;  %585 = vst [vmem:[%s916_s3 + $0x88] sm:$0xff] %v484_v41  ;;  %v283_v46 = vpop.f32.mrf.mxu0  ;;  %v323_v47 = vpop.f32.mrf.mxu1 }
  0xe9   :  { %v506_v48 = vmax.f32 %v469_v44, 0.0  ;;  %v522_v49 = vmax.f32 %v485_v45, 0.0  ;;  %v470_v50 = vadd.f32 %v783_v31, %v283_v46  ;;  %v486_v51 = vadd.f32 %v783_v31, %v323_v47 }
  0xea   :  { %v287_v52 = vpop.f32.mrf.mxu0  ;;  %v327_v53 = vpop.f32.mrf.mxu1 }
  0xeb   :  { %570 = vst [vmem:[%s916_s3 + $0x10] sm:$0xff] %v506_v48  ;;  %586 = vst [vmem:[%s916_s3 + $0x90] sm:$0xff] %v522_v49  ;;  %v471_v54 = vadd.f32 %v781_v30, %v287_v52  ;;  %v487_v55 = vadd.f32 %v781_v30, %v327_v53 }
  0xec   :  { %571 = vst [vmem:[%s916_s3 + $0x18] sm:$0xff] %v470_v50  ;;  %587 = vst [vmem:[%s916_s3 + $0x98] sm:$0xff] %v486_v51  ;;  %v289_v56 = vpop.f32.mrf.mxu0  ;;  %v329_v57 = vpop.f32.mrf.mxu1 }
  0xed   :  { %v508_v58 = vmax.f32 %v471_v54, 0.0  ;;  %v524_v59 = vmax.f32 %v487_v55, 0.0  ;;  %v472_v60 = vadd.f32 %v783_v31, %v289_v56  ;;  %v488_v61 = vadd.f32 %v783_v31, %v329_v57 }
  0xee   :  { %v291_v62 = vpop.f32.mrf.mxu0  ;;  %v331_v63 = vpop.f32.mrf.mxu1 }
  0xef   :  { %572 = vst [vmem:[%s916_s3 + $0x20] sm:$0xff] %v508_v58  ;;  %588 = vst [vmem:[%s916_s3 + $0xa0] sm:$0xff] %v524_v59  ;;  %v473_v0 = vadd.f32 %v781_v30, %v291_v62  ;;  %v489_v1 = vadd.f32 %v781_v30, %v331_v63 }
  0xf0   :  { %573 = vst [vmem:[%s916_s3 + $0x28] sm:$0xff] %v472_v60  ;;  %589 = vst [vmem:[%s916_s3 + $0xa8] sm:$0xff] %v488_v61  ;;  %v293_v2 = vpop.f32.mrf.mxu0  ;;  %v333_v3 = vpop.f32.mrf.mxu1 }
  0xf1   :  { %v510_v4 = vmax.f32 %v473_v0, 0.0  ;;  %v526_v5 = vmax.f32 %v489_v1, 0.0  ;;  %v474_v6 = vadd.f32 %v783_v31, %v293_v2  ;;  %v490_v7 = vadd.f32 %v783_v31, %v333_v3 }
  0xf2   :  { %v297_v8 = vpop.f32.mrf.mxu0  ;;  %v337_v9 = vpop.f32.mrf.mxu1 }
  0xf3   :  { %574 = vst [vmem:[%s916_s3 + $0x30] sm:$0xff] %v510_v4  ;;  %590 = vst [vmem:[%s916_s3 + $0xb0] sm:$0xff] %v526_v5  ;;  %v475_v10 = vadd.f32 %v781_v30, %v297_v8  ;;  %v491_v11 = vadd.f32 %v781_v30, %v337_v9 }
  0xf4   :  { %575 = vst [vmem:[%s916_s3 + $0x38] sm:$0xff] %v474_v6  ;;  %591 = vst [vmem:[%s916_s3 + $0xb8] sm:$0xff] %v490_v7  ;;  %v299_v12 = vpop.f32.mrf.mxu0  ;;  %v339_v13 = vpop.f32.mrf.mxu1 }
  0xf5   :  { %v512_v14 = vmax.f32 %v475_v10, 0.0  ;;  %v528_v15 = vmax.f32 %v491_v11, 0.0  ;;  %v476_v16 = vadd.f32 %v783_v31, %v299_v12  ;;  %v492_v17 = vadd.f32 %v783_v31, %v339_v13 }
  0xf6   :  { %v301_v18 = vpop.f32.mrf.mxu0  ;;  %v341_v19 = vpop.f32.mrf.mxu1 }
  0xf7   :  { %576 = vst [vmem:[%s916_s3 + $0x40] sm:$0xff] %v512_v14  ;;  %592 = vst [vmem:[%s916_s3 + $0xc0] sm:$0xff] %v528_v15  ;;  %v477_v20 = vadd.f32 %v781_v30, %v301_v18  ;;  %v493_v21 = vadd.f32 %v781_v30, %v341_v19 }
  0xf8   :  { %577 = vst [vmem:[%s916_s3 + $0x48] sm:$0xff] %v476_v16  ;;  %593 = vst [vmem:[%s916_s3 + $0xc8] sm:$0xff] %v492_v17  ;;  %v303_v22 = vpop.f32.mrf.mxu0  ;;  %v343_v23 = vpop.f32.mrf.mxu1 }
  0xf9   :  { %v514_v24 = vmax.f32 %v477_v20, 0.0  ;;  %v530_v25 = vmax.f32 %v493_v21, 0.0  ;;  %v478_v26 = vadd.f32 %v783_v31, %v303_v22  ;;  %v494_v27 = vadd.f32 %v783_v31, %v343_v23 }
  0xfa   :  { %v307_v28 = vpop.f32.mrf.mxu0  ;;  %v347_v29 = vpop.f32.mrf.mxu1 }
  0xfb   :  { %578 = vst [vmem:[%s916_s3 + $0x50] sm:$0xff] %v514_v24  ;;  %594 = vst [vmem:[%s916_s3 + $0xd0] sm:$0xff] %v530_v25  ;;  %v479_v32 = vadd.f32 %v781_v30, %v307_v28  ;;  %v495_v33 = vadd.f32 %v781_v30, %v347_v29 }
  0xfc   :  { %579 = vst [vmem:[%s916_s3 + $0x58] sm:$0xff] %v478_v26  ;;  %595 = vst [vmem:[%s916_s3 + $0xd8] sm:$0xff] %v494_v27  ;;  %v309_v34 = vpop.f32.mrf.mxu0  ;;  %v349_v35 = vpop.f32.mrf.mxu1 }
  0xfd   :  { %v516_v36 = vmax.f32 %v479_v32, 0.0  ;;  %v532_v37 = vmax.f32 %v495_v33, 0.0  ;;  %v480_v38 = vadd.f32 %v783_v31, %v309_v34  ;;  %v496_v39 = vadd.f32 %v783_v31, %v349_v35 }
  0xfe   :  { %v311_v40 = vpop.f32.mrf.mxu0  ;;  %v351_v41 = vpop.f32.mrf.mxu1 }
  0xff   :  { %580 = vst [vmem:[%s916_s3 + $0x60] sm:$0xff] %v516_v36  ;;  %596 = vst [vmem:[%s916_s3 + $0xe0] sm:$0xff] %v532_v37  ;;  %v481_v42 = vadd.f32 %v781_v30, %v311_v40  ;;  %v497_v43 = vadd.f32 %v781_v30, %v351_v41 }
 0x100   :  { %581 = vst [vmem:[%s916_s3 + $0x68] sm:$0xff] %v480_v38  ;;  %597 = vst [vmem:[%s916_s3 + $0xe8] sm:$0xff] %v496_v39  ;;  %v313_v44 = vpop.f32.mrf.mxu0  ;;  %v353_v45 = vpop.f32.mrf.mxu1 }
 0x101   :  { %v518_v46 = vmax.f32 %v481_v42, 0.0  ;;  %v534_v47 = vmax.f32 %v497_v43, 0.0  ;;  %v482_v48 = vadd.f32 %v783_v31, %v313_v44  ;;  %v498_v49 = vadd.f32 %v783_v31, %v353_v45 }
 0x103   :  { %582 = vst [vmem:[%s916_s3 + $0x70] sm:$0xff] %v518_v46  ;;  %598 = vst [vmem:[%s916_s3 + $0xf0] sm:$0xff] %v534_v47 }
 0x104   :  { %583 = vst [vmem:[%s916_s3 + $0x78] sm:$0xff] %v482_v48  ;;  %599 = vst [vmem:[%s916_s3 + $0xf8] sm:$0xff] %v498_v49 }

// kernel: _lambda_.5
= control target key start
LH: loop header
LB: loop body
LE: loop exit
PB: predicated region body
PF: predicated region fallthrough
CT: control target
= control target key end

     0   :  { %s708_s1 = inlined_call_operand.vmem [shape: bf16[128,128], index: 1, kind: input, shape index: {}]   ;;  %s709_s0 = inlined_call_operand.vmem [shape: bf16[128,128], index: 0, kind: input, shape index: {}]   ;;  %s710_s2 = inlined_call_operand.vmem [shape: f32[1,128], index: 2, kind: input, shape index: {}]   ;;  %s711_s3 = inlined_call_operand.vmem [shape: f32[128,128], index: 3, kind: input, shape index: {}]   ;;  %s712_s4 = inlined_call_operand.vmem [shape: f32[128,128], index: 4, kind: output, shape index: {}]  }
   0x1   :  { %v502_v0 = vld [vmem:[%s708_s1 + $0x38] sm:$0xff]   ;;  %v503_v1 = vld [vmem:[%s708_s1 + $0x30] sm:$0xff]   ;;  %v504_v2 = vld [vmem:[%s708_s1 + $0x28] sm:$0xff]  }
   0x2   :  { %454 = vmatprep.subr.bf16.mxu0 %v502_v0  ;;  %486 = vmatprep.subr.bf16.mxu1 %v502_v0  ;;  %v505_v3 = vld [vmem:[%s708_s1 + $0x20] sm:$0xff]   ;;  %v506_v6 = vld [vmem:[%s708_s1 + $0x18] sm:$0xff]   ;;  %v507_v7 = vld [vmem:[%s708_s1 + $0x10] sm:$0xff]  }
   0x3   :  { %455 = vmatpush3.bf16.msra.mxu0 %v502_v0  ;;  %494 = vmatpush3.bf16.msra.mxu1 %v502_v0  ;;  %v510_v4 = vld [vmem:[%s709_s0] sm:$0xff]   ;;  %v508_v8 = vld [vmem:[%s708_s1 + $0x8] sm:$0xff]   ;;  %v514_v12 = vld [vmem:[%s709_s0 + $0x10] sm:$0xff]  }
   0x4   :  { %456 = vmatprep.subr.bf16.mxu0 %v503_v1  ;;  %487 = vmatprep.subr.bf16.mxu1 %v503_v1  ;;  %v511_v5 = vld [vmem:[%s709_s0 + $0x20] sm:$0xff]   ;;  %v512_v10 = vld [vmem:[%s709_s0 + $0x8] sm:$0xff]   ;;  %v515_v13 = vld [vmem:[%s709_s0 + $0x30] sm:$0xff]  }
   0x5   :  { %470 = vmatprep.mubr.bf16.mxu0 %v510_v4  ;;  %478 = vmatprep.mubr.bf16.mxu1 %v511_v5  ;;  %v509_v9 = vld [vmem:[%s708_s1] sm:$0xff]   ;;  %v513_v11 = vld [vmem:[%s709_s0 + $0x28] sm:$0xff]   ;;  %v516_v14 = vld [vmem:[%s709_s0 + $0x18] sm:$0xff]  }
   0x6   :  { %v517_v15 = vld [vmem:[%s709_s0 + $0x38] sm:$0xff]   ;;  %v594_v16 = vld [vmem:[%s710_s2] ss:$0 sm:$0xff]  ;;  %v355_v18 = vld [vmem:[%s711_s3 + $0x10] sm:$0xff] }
   0x7   :  { %457 = vmatpush3.bf16.msra.mxu0 %v503_v1  ;;  %495 = vmatpush3.bf16.msra.mxu1 %v503_v1  ;;  %v363_v20 = vld [vmem:[%s711_s3 + $0x50] sm:$0xff]  ;;  %v353_v24 = vld [vmem:[%s711_s3] sm:$0xff]  ;;  %v356_v37 = vld [vmem:[%s711_s3 + $0x18] sm:$0xff] }
   0x8   :  { %458 = vmatprep.subr.bf16.mxu0 %v504_v2  ;;  %488 = vmatprep.subr.bf16.mxu1 %v504_v2  ;;  %v361_v26 = vld [vmem:[%s711_s3 + $0x40] sm:$0xff]  ;;  %v364_v38 = vld [vmem:[%s711_s3 + $0x58] sm:$0xff]  ;;  %v354_v42 = vld [vmem:[%s711_s3 + $0x8] sm:$0xff] }
   0x9   :  { %v362_v44 = vld [vmem:[%s711_s3 + $0x48] sm:$0xff]  ;;  %v359_v52 = vld [vmem:[%s711_s3 + $0x30] sm:$0xff]  ;;  %v365_v4 = vld [vmem:[%s711_s3 + $0x60] sm:$0xff] }
   0xa   :  { %v367_v54 = vld [vmem:[%s711_s3 + $0x70] sm:$0xff] }
   0xb   :  { %459 = vmatpush3.bf16.msra.mxu0 %v504_v2  ;;  %496 = vmatpush3.bf16.msra.mxu1 %v504_v2 }
   0xc   :  { %460 = vmatprep.subr.bf16.mxu0 %v505_v3  ;;  %489 = vmatprep.subr.bf16.mxu1 %v505_v3 }
   0xf   :  { %461 = vmatpush3.bf16.msra.mxu0 %v505_v3  ;;  %497 = vmatpush3.bf16.msra.mxu1 %v505_v3  ;;  %v357_v3 = vld [vmem:[%s711_s3 + $0x20] sm:$0xff] }
  0x10   :  { %462 = vmatprep.subr.bf16.mxu0 %v506_v6  ;;  %490 = vmatprep.subr.bf16.mxu1 %v506_v6 }
  0x13   :  { %463 = vmatpush3.bf16.msra.mxu0 %v506_v6  ;;  %498 = vmatpush3.bf16.msra.mxu1 %v506_v6 }
  0x14   :  { %464 = vmatprep.subr.bf16.mxu0 %v507_v7  ;;  %491 = vmatprep.subr.bf16.mxu1 %v507_v7 }
  0x17   :  { %465 = vmatpush3.bf16.msra.mxu0 %v507_v7  ;;  %499 = vmatpush3.bf16.msra.mxu1 %v507_v7 }
  0x18   :  { %466 = vmatprep.subr.bf16.mxu0 %v508_v8  ;;  %492 = vmatprep.subr.bf16.mxu1 %v508_v8 }
  0x1b   :  { %467 = vmatpush3.bf16.msra.mxu0 %v508_v8  ;;  %500 = vmatpush3.bf16.msra.mxu1 %v508_v8  ;;  %v360_v8 = vld [vmem:[%s711_s3 + $0x38] sm:$0xff] }
  0x1c   :  { %468 = vmatprep.subr.bf16.mxu0 %v509_v9  ;;  %493 = vmatprep.subr.bf16.mxu1 %v509_v9 }
  0x1f   :  { %469 = vmatpush3.bf16.msra.mxu0 %v509_v9  ;;  %501 = vmatpush3.bf16.msra.mxu1 %v509_v9 }
  0x22   :  { %471 = vmatmul.mubr.bf16.vlgmr.msra.gmra.mxu0 %v512_v10  ;;  %479 = vmatmul.mubr.bf16.vlgmr.msra.gmra.mxu1 %v513_v11  ;;  %v368_v10 = vld [vmem:[%s711_s3 + $0x78] sm:$0xff] }
  0x23   :  { %474 = vmatprep.mubr.bf16.mxu0 %v514_v12  ;;  %482 = vmatprep.mubr.bf16.mxu1 %v515_v13 }
  0x2a   :  { %475 = vmatmul.mubr.bf16.gmra.mxu0 %v516_v14  ;;  %483 = vmatmul.mubr.bf16.gmra.mxu1 %v517_v15 }
  0xe2   :  { %v472_v17 = vpop.f32.mrf.mxu0  ;;  %v480_v19 = vpop.f32.mrf.mxu1 }
  0xe3   :  { %v339_v21 = vadd.f32 %v472_v17, %v594_v16  ;;  %v347_v22 = vadd.f32 %v480_v19, %v594_v16  ;;  %v358_v19 = vld [vmem:[%s711_s3 + $0x28] sm:$0xff] }
  0xe4   :  { %v216_v23 = vpop.f32.mrf.mxu0  ;;  %v248_v25 = vpop.f32.mrf.mxu1 }
  0xe5   :  { %v371_v27 = vadd.f32 %v355_v18, %v339_v21  ;;  %v379_v28 = vadd.f32 %v363_v20, %v347_v22  ;;  %v337_v29 = vadd.f32 %v594_v16, %v216_v23  ;;  %v345_v30 = vadd.f32 %v594_v16, %v248_v25  ;;  %v366_v21 = vld [vmem:[%s711_s3 + $0x68] sm:$0xff] }
  0xe6   :  { %v473_v31 = vpop.f32.mrf.mxu0  ;;  %v481_v32 = vpop.f32.mrf.mxu1 }
  0xe7   :  { %v387_v33 = vmax.f32 %v371_v27, 0.0  ;;  %v395_v34 = vmax.f32 %v379_v28, 0.0  ;;  %v369_v35 = vadd.f32 %v353_v24, %v337_v29  ;;  %v377_v36 = vadd.f32 %v361_v26, %v345_v30 }
  0xe8   :  { %v340_v39 = vadd.f32 %v473_v31, %v594_v16  ;;  %v348_v40 = vadd.f32 %v481_v32, %v594_v16  ;;  %v219_v41 = vpop.f32.mrf.mxu0  ;;  %v251_v43 = vpop.f32.mrf.mxu1 }
  0xe9   :  { %403 = vst [vmem:[%s712_s4 + $0x10] sm:$0xff] %v387_v33  ;;  %411 = vst [vmem:[%s712_s4 + $0x50] sm:$0xff] %v395_v34  ;;  %v385_v45 = vmax.f32 %v369_v35, 0.0  ;;  %v393_v46 = vmax.f32 %v377_v36, 0.0  ;;  %v338_v47 = vadd.f32 %v594_v16, %v219_v41  ;;  %v346_v48 = vadd.f32 %v594_v16, %v251_v43 }
  0xea   :  { %v372_v49 = vadd.f32 %v356_v37, %v340_v39  ;;  %v380_v50 = vadd.f32 %v364_v38, %v348_v40  ;;  %v476_v51 = vpop.f32.mrf.mxu0  ;;  %v484_v53 = vpop.f32.mrf.mxu1 }
  0xeb   :  { %401 = vst [vmem:[%s712_s4] sm:$0xff] %v385_v45  ;;  %409 = vst [vmem:[%s712_s4 + $0x40] sm:$0xff] %v393_v46  ;;  %v370_v55 = vadd.f32 %v354_v42, %v338_v47  ;;  %v378_v56 = vadd.f32 %v362_v44, %v346_v48  ;;  %v343_v57 = vadd.f32 %v476_v51, %v594_v16 }
  0xec   :  { %v351_v58 = vadd.f32 %v484_v53, %v594_v16  ;;  %v388_v59 = vmax.f32 %v372_v49, 0.0  ;;  %v396_v60 = vmax.f32 %v380_v50, 0.0  ;;  %v232_v61 = vpop.f32.mrf.mxu0  ;;  %v264_v62 = vpop.f32.mrf.mxu1 }
  0xed   :  { %v386_v63 = vmax.f32 %v370_v55, 0.0  ;;  %v394_v0 = vmax.f32 %v378_v56, 0.0  ;;  %v375_v1 = vadd.f32 %v359_v52, %v343_v57  ;;  %v341_v5 = vadd.f32 %v594_v16, %v232_v61 }
  0xee   :  { %v383_v2 = vadd.f32 %v367_v54, %v351_v58  ;;  %404 = vst [vmem:[%s712_s4 + $0x18] sm:$0xff] %v388_v59  ;;  %412 = vst [vmem:[%s712_s4 + $0x58] sm:$0xff] %v396_v60  ;;  %v349_v6 = vadd.f32 %v594_v16, %v264_v62  ;;  %v477_v7 = vpop.f32.mrf.mxu0  ;;  %v485_v9 = vpop.f32.mrf.mxu1 }
  0xef   :  { %402 = vst [vmem:[%s712_s4 + $0x8] sm:$0xff] %v386_v63  ;;  %410 = vst [vmem:[%s712_s4 + $0x48] sm:$0xff] %v394_v0  ;;  %v391_v11 = vmax.f32 %v375_v1, 0.0  ;;  %v344_v13 = vadd.f32 %v477_v7, %v594_v16  ;;  %v352_v14 = vadd.f32 %v485_v9, %v594_v16  ;;  %v373_v15 = vadd.f32 %v357_v3, %v341_v5 }
  0xf0   :  { %v399_v12 = vmax.f32 %v383_v2, 0.0  ;;  %v381_v17 = vadd.f32 %v365_v4, %v349_v6  ;;  %v235_v18 = vpop.f32.mrf.mxu0  ;;  %v267_v20 = vpop.f32.mrf.mxu1 }
  0xf1   :  { %407 = vst [vmem:[%s712_s4 + $0x30] sm:$0xff] %v391_v11  ;;  %v376_v22 = vadd.f32 %v360_v8, %v344_v13  ;;  %v384_v23 = vadd.f32 %v368_v10, %v352_v14  ;;  %v342_v24 = vadd.f32 %v594_v16, %v235_v18  ;;  %v350_v25 = vadd.f32 %v594_v16, %v267_v20 }
  0xf2   :  { %415 = vst [vmem:[%s712_s4 + $0x70] sm:$0xff] %v399_v12  ;;  %v389_v26 = vmax.f32 %v373_v15, 0.0  ;;  %v397_v27 = vmax.f32 %v381_v17, 0.0 }
  0xf3   :  { %v392_v28 = vmax.f32 %v376_v22, 0.0  ;;  %v400_v29 = vmax.f32 %v384_v23, 0.0  ;;  %v374_v30 = vadd.f32 %v358_v19, %v342_v24  ;;  %v382_v31 = vadd.f32 %v366_v21, %v350_v25 }
  0xf4   :  { %405 = vst [vmem:[%s712_s4 + $0x20] sm:$0xff] %v389_v26  ;;  %413 = vst [vmem:[%s712_s4 + $0x60] sm:$0xff] %v397_v27 }
  0xf5   :  { %408 = vst [vmem:[%s712_s4 + $0x38] sm:$0xff] %v392_v28  ;;  %416 = vst [vmem:[%s712_s4 + $0x78] sm:$0xff] %v400_v29  ;;  %v390_v16 = vmax.f32 %v374_v30, 0.0  ;;  %v398_v32 = vmax.f32 %v382_v31, 0.0 }
  0xf7   :  { %406 = vst [vmem:[%s712_s4 + $0x28] sm:$0xff] %v390_v16  ;;  %414 = vst [vmem:[%s712_s4 + $0x68] sm:$0xff] %v398_v32 }

// kernel: _lambda_.6
= control target key start
LH: loop header
LB: loop body
LE: loop exit
PB: predicated region body
PF: predicated region fallthrough
CT: control target
= control target key end

     0   :  { %s602_s1 = inlined_call_operand.vmem [shape: bf16[128,128], index: 1, kind: input, shape index: {}]   ;;  %s603_s0 = inlined_call_operand.vmem [shape: bf16[128,128], index: 0, kind: input, shape index: {}]   ;;  %s604_s2 = inlined_call_operand.vmem [shape: f32[1,128], index: 2, kind: input, shape index: {}]   ;;  %s605_s3 = inlined_call_operand.vmem [shape: f32[128,128], index: 3, kind: output, shape index: {}]  }
   0x1   :  { %v467_v0 = vld [vmem:[%s602_s1 + $0x38] sm:$0xff]   ;;  %v468_v1 = vld [vmem:[%s602_s1 + $0x30] sm:$0xff]   ;;  %v469_v2 = vld [vmem:[%s602_s1 + $0x28] sm:$0xff]  }
   0x2   :  { %419 = vmatprep.subr.bf16.mxu0 %v467_v0  ;;  %451 = vmatprep.subr.bf16.mxu1 %v467_v0  ;;  %v470_v3 = vld [vmem:[%s602_s1 + $0x20] sm:$0xff]   ;;  %v471_v6 = vld [vmem:[%s602_s1 + $0x18] sm:$0xff]   ;;  %v472_v7 = vld [vmem:[%s602_s1 + $0x10] sm:$0xff]  }
   0x3   :  { %420 = vmatpush3.bf16.msra.mxu0 %v467_v0  ;;  %459 = vmatpush3.bf16.msra.mxu1 %v467_v0  ;;  %v475_v4 = vld [vmem:[%s603_s0] sm:$0xff]   ;;  %v473_v8 = vld [vmem:[%s602_s1 + $0x8] sm:$0xff]   ;;  %v479_v12 = vld [vmem:[%s603_s0 + $0x10] sm:$0xff]  }
   0x4   :  { %421 = vmatprep.subr.bf16.mxu0 %v468_v1  ;;  %452 = vmatprep.subr.bf16.mxu1 %v468_v1  ;;  %v476_v5 = vld [vmem:[%s603_s0 + $0x20] sm:$0xff]   ;;  %v477_v10 = vld [vmem:[%s603_s0 + $0x8] sm:$0xff]   ;;  %v480_v13 = vld [vmem:[%s603_s0 + $0x30] sm:$0xff]  }
   0x5   :  { %435 = vmatprep.mubr.bf16.mxu0 %v475_v4  ;;  %443 = vmatprep.mubr.bf16.mxu1 %v476_v5  ;;  %v474_v9 = vld [vmem:[%s602_s1] sm:$0xff]   ;;  %v478_v11 = vld [vmem:[%s603_s0 + $0x28] sm:$0xff]   ;;  %v481_v14 = vld [vmem:[%s603_s0 + $0x18] sm:$0xff]  }
   0x6   :  { %v482_v15 = vld [vmem:[%s603_s0 + $0x38] sm:$0xff]   ;;  %v402_v16 = vld [vmem:[%s604_s2] ss:$0 sm:$0xff] }
   0x7   :  { %422 = vmatpush3.bf16.msra.mxu0 %v468_v1  ;;  %460 = vmatpush3.bf16.msra.mxu1 %v468_v1 }
   0x8   :  { %423 = vmatprep.subr.bf16.mxu0 %v469_v2  ;;  %453 = vmatprep.subr.bf16.mxu1 %v469_v2 }
   0xb   :  { %424 = vmatpush3.bf16.msra.mxu0 %v469_v2  ;;  %461 = vmatpush3.bf16.msra.mxu1 %v469_v2 }
   0xc   :  { %425 = vmatprep.subr.bf16.mxu0 %v470_v3  ;;  %454 = vmatprep.subr.bf16.mxu1 %v470_v3 }
   0xf   :  { %426 = vmatpush3.bf16.msra.mxu0 %v470_v3  ;;  %462 = vmatpush3.bf16.msra.mxu1 %v470_v3 }
  0x10   :  { %427 = vmatprep.subr.bf16.mxu0 %v471_v6  ;;  %455 = vmatprep.subr.bf16.mxu1 %v471_v6 }
  0x13   :  { %428 = vmatpush3.bf16.msra.mxu0 %v471_v6  ;;  %463 = vmatpush3.bf16.msra.mxu1 %v471_v6 }
  0x14   :  { %429 = vmatprep.subr.bf16.mxu0 %v472_v7  ;;  %456 = vmatprep.subr.bf16.mxu1 %v472_v7 }
  0x17   :  { %430 = vmatpush3.bf16.msra.mxu0 %v472_v7  ;;  %464 = vmatpush3.bf16.msra.mxu1 %v472_v7 }
  0x18   :  { %431 = vmatprep.subr.bf16.mxu0 %v473_v8  ;;  %457 = vmatprep.subr.bf16.mxu1 %v473_v8 }
  0x1b   :  { %432 = vmatpush3.bf16.msra.mxu0 %v473_v8  ;;  %465 = vmatpush3.bf16.msra.mxu1 %v473_v8 }
  0x1c   :  { %433 = vmatprep.subr.bf16.mxu0 %v474_v9  ;;  %458 = vmatprep.subr.bf16.mxu1 %v474_v9 }
  0x1f   :  { %434 = vmatpush3.bf16.msra.mxu0 %v474_v9  ;;  %466 = vmatpush3.bf16.msra.mxu1 %v474_v9 }
  0x22   :  { %436 = vmatmul.mubr.bf16.vlgmr.msra.gmra.mxu0 %v477_v10  ;;  %444 = vmatmul.mubr.bf16.vlgmr.msra.gmra.mxu1 %v478_v11 }
  0x23   :  { %439 = vmatprep.mubr.bf16.mxu0 %v479_v12  ;;  %447 = vmatprep.mubr.bf16.mxu1 %v480_v13 }
  0x2a   :  { %440 = vmatmul.mubr.bf16.gmra.mxu0 %v481_v14  ;;  %448 = vmatmul.mubr.bf16.gmra.mxu1 %v482_v15 }
  0xe2   :  { %v437_v17 = vpop.f32.mrf.mxu0  ;;  %v445_v18 = vpop.f32.mrf.mxu1 }
  0xe3   :  { %v336_v19 = vadd.f32 %v437_v17, %v402_v16  ;;  %v344_v20 = vadd.f32 %v445_v18, %v402_v16 }
  0xe4   :  { %v213_v21 = vpop.f32.mrf.mxu0  ;;  %v245_v22 = vpop.f32.mrf.mxu1 }
  0xe5   :  { %v352_v23 = vmax.f32 %v336_v19, 0.0  ;;  %v360_v24 = vmax.f32 %v344_v20, 0.0  ;;  %v334_v25 = vadd.f32 %v402_v16, %v213_v21  ;;  %v342_v26 = vadd.f32 %v402_v16, %v245_v22 }
  0xe6   :  { %v438_v27 = vpop.f32.mrf.mxu0  ;;  %v446_v28 = vpop.f32.mrf.mxu1 }
  0xe7   :  { %368 = vst [vmem:[%s605_s3 + $0x10] sm:$0xff] %v352_v23  ;;  %376 = vst [vmem:[%s605_s3 + $0x50] sm:$0xff] %v360_v24  ;;  %v350_v29 = vmax.f32 %v334_v25, 0.0  ;;  %v358_v30 = vmax.f32 %v342_v26, 0.0  ;;  %v337_v31 = vadd.f32 %v438_v27, %v402_v16  ;;  %v345_v32 = vadd.f32 %v446_v28, %v402_v16 }
  0xe8   :  { %v216_v33 = vpop.f32.mrf.mxu0  ;;  %v248_v34 = vpop.f32.mrf.mxu1 }
  0xe9   :  { %366 = vst [vmem:[%s605_s3] sm:$0xff] %v350_v29  ;;  %374 = vst [vmem:[%s605_s3 + $0x40] sm:$0xff] %v358_v30  ;;  %v353_v35 = vmax.f32 %v337_v31, 0.0  ;;  %v361_v36 = vmax.f32 %v345_v32, 0.0  ;;  %v335_v37 = vadd.f32 %v402_v16, %v216_v33  ;;  %v343_v38 = vadd.f32 %v402_v16, %v248_v34 }
  0xea   :  { %v441_v39 = vpop.f32.mrf.mxu0  ;;  %v449_v40 = vpop.f32.mrf.mxu1 }
  0xeb   :  { %369 = vst [vmem:[%s605_s3 + $0x18] sm:$0xff] %v353_v35  ;;  %377 = vst [vmem:[%s605_s3 + $0x58] sm:$0xff] %v361_v36  ;;  %v351_v41 = vmax.f32 %v335_v37, 0.0  ;;  %v359_v42 = vmax.f32 %v343_v38, 0.0  ;;  %v340_v43 = vadd.f32 %v441_v39, %v402_v16  ;;  %v348_v44 = vadd.f32 %v449_v40, %v402_v16 }
  0xec   :  { %v229_v45 = vpop.f32.mrf.mxu0  ;;  %v261_v46 = vpop.f32.mrf.mxu1 }
  0xed   :  { %367 = vst [vmem:[%s605_s3 + $0x8] sm:$0xff] %v351_v41  ;;  %375 = vst [vmem:[%s605_s3 + $0x48] sm:$0xff] %v359_v42  ;;  %v356_v47 = vmax.f32 %v340_v43, 0.0  ;;  %v364_v48 = vmax.f32 %v348_v44, 0.0  ;;  %v338_v49 = vadd.f32 %v402_v16, %v229_v45  ;;  %v346_v50 = vadd.f32 %v402_v16, %v261_v46 }
  0xee   :  { %v442_v51 = vpop.f32.mrf.mxu0  ;;  %v450_v52 = vpop.f32.mrf.mxu1 }
  0xef   :  { %372 = vst [vmem:[%s605_s3 + $0x30] sm:$0xff] %v356_v47  ;;  %380 = vst [vmem:[%s605_s3 + $0x70] sm:$0xff] %v364_v48  ;;  %v354_v53 = vmax.f32 %v338_v49, 0.0  ;;  %v362_v54 = vmax.f32 %v346_v50, 0.0  ;;  %v341_v55 = vadd.f32 %v442_v51, %v402_v16  ;;  %v349_v56 = vadd.f32 %v450_v52, %v402_v16 }
  0xf0   :  { %v232_v57 = vpop.f32.mrf.mxu0  ;;  %v264_v58 = vpop.f32.mrf.mxu1 }
  0xf1   :  { %370 = vst [vmem:[%s605_s3 + $0x20] sm:$0xff] %v354_v53  ;;  %378 = vst [vmem:[%s605_s3 + $0x60] sm:$0xff] %v362_v54  ;;  %v357_v59 = vmax.f32 %v341_v55, 0.0  ;;  %v365_v60 = vmax.f32 %v349_v56, 0.0  ;;  %v339_v61 = vadd.f32 %v402_v16, %v232_v57  ;;  %v347_v62 = vadd.f32 %v402_v16, %v264_v58 }
  0xf3   :  { %373 = vst [vmem:[%s605_s3 + $0x38] sm:$0xff] %v357_v59  ;;  %381 = vst [vmem:[%s605_s3 + $0x78] sm:$0xff] %v365_v60  ;;  %v355_v63 = vmax.f32 %v339_v61, 0.0  ;;  %v363_v0 = vmax.f32 %v347_v62, 0.0 }
  0xf5   :  { %371 = vst [vmem:[%s605_s3 + $0x28] sm:$0xff] %v355_v63  ;;  %379 = vst [vmem:[%s605_s3 + $0x68] sm:$0xff] %v363_v0 }

</bundles_post_ra>
